<compile_context>
chip_gen: v6e
topology: v6e:2x2x1
jax: 0.10.0
libtpu: 0.0.40
codegen_flags: <defaults>
</compile_context>

<pallas_src>
import jax
import jax.numpy as jnp
from jax.experimental import pallas as pl
from jax.experimental.pallas import tpu as pltpu

_HIDDEN = 8                        # logical hidden width: Linear(cond_features, 8)
_OUT = 4                           # logical output width: Linear(8, 4)
_LANE = 128                        # TPU lane width; pad hidden/output to full vreg lanes
_VMEM_BUDGET = 24 * 1024 * 1024    # cap for double-buffered input+output tiles
_VMEM_LIMIT = 32 * 1024 * 1024     # explicit scoped-VMEM limit (safe on v5e/v6e/v7x)


def _round_up(x: int, m: int) -> int:
    return ((x + m - 1) // m) * m


def _condnet_kernel(x_ref, w1_ref, b1_ref, w2_ref, b2_ref, o_ref):
    # Linear -> Tanh -> Linear on one (TB, cond_features) batch tile, all in VMEM.
    # Hidden/output dims are pre-padded to 128 lanes, so both matmuls are full-lane
    # MXU ops and the store below is an unmasked, lane-dense vst.
    x = x_ref[...]
    h = jnp.dot(x, w1_ref[...], preferred_element_type=jnp.float32) + b1_ref[...]
    h = jnp.tanh(h)
    y = jnp.dot(h, w2_ref[...], preferred_element_type=jnp.float32) + b2_ref[...]
    o_ref[...] = y.astype(o_ref.dtype)


def cond_net_forward(conds, w1, b1, w2, b2, *, block_batch: int = 1024):
    """Pallas implementation of CondNet.forward / INN._calculate_condition.

    conds: (batch, cond_features) float32
    w1:    (cond_features, 8)     float32   (stored (in, out): kernel computes x @ W + b)
    b1:    (1, 8)                 float32
    w2:    (8, 4)                 float32
    b2:    (1, 4)                 float32
    returns (batch, 4) float32
    """
    batch, cond_features = conds.shape
    hidden = w1.shape[1]
    out_dim = w2.shape[1]

    # --- Pad hidden / output dims to a full 128-lane width (math unchanged). ---
    w1p = jnp.zeros((cond_features, _LANE), jnp.float32).at[:, :hidden].set(
        w1.astype(jnp.float32))
    b1p = jnp.zeros((1, _LANE), jnp.float32).at[:, :hidden].set(
        b1.astype(jnp.float32).reshape(1, hidden))
    w2p = jnp.zeros((_LANE, _LANE), jnp.float32).at[:hidden, :out_dim].set(
        w2.astype(jnp.float32))
    b2p = jnp.zeros((1, _LANE), jnp.float32).at[:, :out_dim].set(
        b2.astype(jnp.float32).reshape(1, out_dim))

    # --- Choose the batch tile: biggest that fits the VMEM budget. ---
    # Per-row cost: double-buffered f32 input row + double-buffered 128-wide f32 output row.
    bytes_per_row = 2 * 4 * (cond_features + _LANE)
    tb_cap = max(8, (_VMEM_BUDGET // bytes_per_row) // 8 * 8)
    tb = max(8, min(block_batch, tb_cap, _round_up(batch, 8)))

    padded_batch = _round_up(batch, tb)
    x = conds.astype(jnp.float32)
    if padded_batch != batch:
        x = jnp.pad(x, ((0, padded_batch - batch), (0, 0)))

    grid = (padded_batch // tb,)

    out_padded = pl.pallas_call(
        _condnet_kernel,
        out_shape=jax.ShapeDtypeStruct((padded_batch, _LANE), jnp.float32),
        grid_spec=pl.GridSpec(
            grid=grid,
            in_specs=[
                # Batch-tiled input: pipelined/double-buffered across grid steps.
                pl.BlockSpec((tb, cond_features), lambda i: (i, 0)),
                # Weights/biases: constant index_map -> stay resident in VMEM.
                pl.BlockSpec((cond_features, _LANE), lambda i: (0, 0)),
                pl.BlockSpec((1, _LANE), lambda i: (0, 0)),
                pl.BlockSpec((_LANE, _LANE), lambda i: (0, 0)),
                pl.BlockSpec((1, _LANE), lambda i: (0, 0)),
            ],
            out_specs=pl.BlockSpec((tb, _LANE), lambda i: (i, 0)),
        ),
        compiler_params=pltpu.CompilerParams(
            # Batch tiles are independent: parallel lets Mosaic shard them across
            # both TensorCores on v7x (no-op on v5e/v6e).
            dimension_semantics=("parallel",),
            vmem_limit_bytes=_VMEM_LIMIT,
        ),
    )(x, w1p, b1p, w2p, b2p)

    # Drop batch padding and the lane padding of the output.
    return out_padded[:batch, :out_dim]


def init_condnet_params(key, cond_features: int):
    """Deterministic synthetic init matching nn.Linear shapes of CondNet.

    PyTorch: Linear(cond_features, 8) then Linear(8, 4).
    Stored as (in, out) so the kernel does x @ W + b (== PyTorch's x @ W.T + b).
    """
    k1, k2, k3, k4 = jax.random.split(key, 4)
    hidden, out_dim = _HIDDEN, _OUT
    lim1 = 1.0 / jnp.sqrt(cond_features)
    lim2 = 1.0 / jnp.sqrt(hidden)
    w1 = jax.random.uniform(k1, (cond_features, hidden), jnp.float32, -lim1, lim1)
    b1 = jax.random.uniform(k2, (1, hidden), jnp.float32, -lim1, lim1)
    w2 = jax.random.uniform(k3, (hidden, out_dim), jnp.float32, -lim2, lim2)
    b2 = jax.random.uniform(k4, (1, out_dim), jnp.float32, -lim2, lim2)
    return w1, b1, w2, b2


if __name__ == "__main__":
    key = jax.random.PRNGKey(0)
    k_in, k_in2, k_params = jax.random.split(key, 3)

    cond_features = 16
    horizon = 8  # stored on the module but unused by the conditioning forward path

    w1, b1, w2, b2 = init_condnet_params(k_params, cond_features)

    def ref_fn(c):
        # Pure-JAX reference of the same math.
        return jnp.tanh(c @ w1 + b1) @ w2 + b2

    # Small shape consistent with the module.
    conds = jax.random.normal(k_in, (8, cond_features), dtype=jnp.float32)
    out = jax.block_until_ready(cond_net_forward(conds, w1, b1, w2, b2))
    assert out.shape == (8, _OUT)
    assert jnp.allclose(out, ref_fn(conds), atol=1e-5, rtol=1e-5)

    # Exercise the multi-step tiled path (several grid iterations + ragged last tile).
    conds2 = jax.random.normal(k_in2, (200, cond_features), dtype=jnp.float32)
    out2 = jax.block_until_ready(
        cond_net_forward(conds2, w1, b1, w2, b2, block_batch=64))
    assert out2.shape == (200, _OUT)
    assert jnp.allclose(out2, ref_fn(conds2), atol=1e-5, rtol=1e-5)

    print("KERNEL_OK")
</pallas_src>

<mosaic_0001>
module attributes {stable_mosaic.version = 11 : i64} {
  func.func @_condnet_kernel(%arg0: i32, %arg1: memref<8x16xf32, #tpu.memory_space<vmem>>, %arg2: memref<16x128xf32, #tpu.memory_space<vmem>>, %arg3: memref<1x128xf32, #tpu.memory_space<vmem>>, %arg4: memref<128x128xf32, #tpu.memory_space<vmem>>, %arg5: memref<1x128xf32, #tpu.memory_space<vmem>>, %arg6: memref<8x128xf32, #tpu.memory_space<vmem>>) attributes {dimension_semantics = [#tpu.dimension_semantics<parallel>], iteration_bounds = array<i64: 1>, scalar_prefetch = 0 : i64, scratch_operands = 0 : i64, tpu.core_type = #tpu.core_type<tc>, window_params = [{transform_indices = @transform_0, window_bounds = array<i64: 8, 16>}, {pipeline_mode = #tpu.pipeline_mode<synchronous>, transform_indices = @transform_1, window_bounds = array<i64: 16, 128>}, {pipeline_mode = #tpu.pipeline_mode<synchronous>, transform_indices = @transform_2, window_bounds = array<i64: 1, 128>}, {pipeline_mode = #tpu.pipeline_mode<synchronous>, transform_indices = @transform_3, window_bounds = array<i64: 128, 128>}, {pipeline_mode = #tpu.pipeline_mode<synchronous>, transform_indices = @transform_4, window_bounds = array<i64: 1, 128>}, {transform_indices = @transform_5, window_bounds = array<i64: 8, 128>}]} {
    %c0 = arith.constant 0 : index
    %c0_0 = arith.constant 0 : index
    %0 = vector.load %arg1[%c0, %c0_0] : memref<8x16xf32, #tpu.memory_space<vmem>>, vector<8x16xf32>
    %c0_1 = arith.constant 0 : index
    %c0_2 = arith.constant 0 : index
    %1 = vector.load %arg2[%c0_1, %c0_2] : memref<16x128xf32, #tpu.memory_space<vmem>>, vector<16x128xf32>
    %cst = arith.constant dense<0.000000e+00> : vector<8x128xf32>
    %2 = tpu.matmul %0, %1, %cst {dimension_numbers = #tpu.dot_dimension_numbers<[1], [0], [0], [1], [0, 0, 1, 1], [], []>} : vector<8x16xf32>, vector<16x128xf32>, vector<8x128xf32> -> vector<8x128xf32>
    %c0_3 = arith.constant 0 : index
    %c0_4 = arith.constant 0 : index
    %3 = vector.load %arg3[%c0_3, %c0_4] : memref<1x128xf32, #tpu.memory_space<vmem>>, vector<1x128xf32>
    %4 = vector.broadcast %3 : vector<1x128xf32> to vector<8x128xf32>
    %5 = arith.addf %2, %4 : vector<8x128xf32>
    %6 = math.tanh %5 : vector<8x128xf32>
    %c0_5 = arith.constant 0 : index
    %c0_6 = arith.constant 0 : index
    %7 = vector.load %arg4[%c0_5, %c0_6] : memref<128x128xf32, #tpu.memory_space<vmem>>, vector<128x128xf32>
    %cst_7 = arith.constant dense<0.000000e+00> : vector<8x128xf32>
    %8 = tpu.matmul %6, %7, %cst_7 {dimension_numbers = #tpu.dot_dimension_numbers<[1], [0], [0], [1], [0, 0, 1, 1], [], []>} : vector<8x128xf32>, vector<128x128xf32>, vector<8x128xf32> -> vector<8x128xf32>
    %c0_8 = arith.constant 0 : index
    %c0_9 = arith.constant 0 : index
    %9 = vector.load %arg5[%c0_8, %c0_9] : memref<1x128xf32, #tpu.memory_space<vmem>>, vector<1x128xf32>
    %10 = vector.broadcast %9 : vector<1x128xf32> to vector<8x128xf32>
    %11 = arith.addf %8, %10 : vector<8x128xf32>
    %c0_10 = arith.constant 0 : index
    %c0_11 = arith.constant 0 : index
    %12 = vector.load %arg6[%c0_10, %c0_11] : memref<8x128xf32, #tpu.memory_space<vmem>>, vector<8x128xf32>
    tpu.vector_store %arg6[%c0_10, %c0_11], %11 {strides = array<i32>} : memref<8x128xf32, #tpu.memory_space<vmem>>, vector<8x128xf32>,
    return
  }
  func.func @transform_0(%arg0: i32) -> (i32, i32) {
    %c0_i32 = arith.constant 0 : i32
    %c0_i32_0 = arith.constant 0 : i32
    return %arg0, %c0_i32 : i32, i32
  }
  func.func @transform_1(%arg0: i32) -> (i32, i32) {
    %c0_i32 = arith.constant 0 : i32
    %c0_i32_0 = arith.constant 0 : i32
    %c0_i32_1 = arith.constant 0 : i32
    return %c0_i32, %c0_i32_0 : i32, i32
  }
  func.func @transform_2(%arg0: i32) -> (i32, i32) {
    %c0_i32 = arith.constant 0 : i32
    %c0_i32_0 = arith.constant 0 : i32
    %c0_i32_1 = arith.constant 0 : i32
    return %c0_i32, %c0_i32_0 : i32, i32
  }
  func.func @transform_3(%arg0: i32) -> (i32, i32) {
    %c0_i32 = arith.constant 0 : i32
    %c0_i32_0 = arith.constant 0 : i32
    %c0_i32_1 = arith.constant 0 : i32
    return %c0_i32, %c0_i32_0 : i32, i32
  }
  func.func @transform_4(%arg0: i32) -> (i32, i32) {
    %c0_i32 = arith.constant 0 : i32
    %c0_i32_0 = arith.constant 0 : i32
    %c0_i32_1 = arith.constant 0 : i32
    return %c0_i32, %c0_i32_0 : i32, i32
  }
  func.func @transform_5(%arg0: i32) -> (i32, i32) {
    %c0_i32 = arith.constant 0 : i32
    %c0_i32_0 = arith.constant 0 : i32
    return %arg0, %c0_i32 : i32, i32
  }
}

</mosaic_0001>

<bundles_post_ra>
// kernel: tpu_custom_call.1
= control target key start
LH: loop header
LB: loop body
LE: loop exit
PB: predicated region body
PF: predicated region fallthrough
CT: control target
= control target key end

     0   :  { %10 = vsyncpa [#allocation3], 0  ;;  %s472_s0 = inlined_call_operand.hbm [shape: f32[8,16], index: 0, kind: input, shape index: {}]   ;;  %s473_s1 = inlined_call_operand.hbm [shape: f32[16,128], index: 1, kind: input, shape index: {}]   ;;  %s474_s2 = inlined_call_operand.vmem [shape: f32[1,128], index: 2, kind: input, shape index: {}]   ;;  %s475_s3 = inlined_call_operand.hbm [shape: f32[128,128], index: 3, kind: input, shape index: {}]   ;;  %s476_s4 = inlined_call_operand.vmem [shape: f32[1,128], index: 4, kind: input, shape index: {}]   ;;  %s477_s5 = inlined_call_operand.hbm [shape: f32[8,128], index: 5, kind: output, shape index: {}]  }
   0x1   :  { %11 = vsyncpa [#allocation6], 0 }
   0x2   :  { %12 = vsyncpa [#allocation4], 0  ;;  %s416_s18 = smov [#allocation5]  }
   0x3   :  { %s28_s19 = sshll.u32 %s416_s18, 4  ;;  %s29_s19 = int_to_ptr.vmem [resolvable:$true] %s28_s19 }
   0x4   :  { %s338_s20 = scalar_lea.vmem %s29_s19, 256  ;;  %p343_p1 = scmp.lt.s32.totalorder %s29_s19, %s29_s19 }
   0x5   :  { %p339_p0 = scmp.ne.s32.totalorder %s29_s19, %s338_s20  ;;  %p344_p2 = scmp.lt.s32.totalorder %s338_s20, %s338_s20 }
   0x7   :  { %p345_p3 = por %p344_p2, %p343_p1 }
   0x9   :  { %p346_p4 = pnand %p345_p3, %p339_p0 }
   0xb   :  { %349 = shalt.err (!%p346_p4)
}
   0xc   :  { %s417_s21 = smov 128   ;;  %s418_s22 = smov 8  }
   0xd   :  { %34 = dma.hbm_to_vmem [thread:$0]  %s473_s1, 256, %s29_s19, [#allocation6], %s417_s21, %s417_s21, %s418_s22  }
   0xe   :  { %s419_s25 = smov [#allocation2]   ;;  %s420_s27 = smov [#allocation7]  }
   0xf   :  { %s19_s26 = sshll.u32 %s419_s25, 4  ;;  %s42_s28 = sshll.u32 %s420_s27, 4  ;;  %s20_s26 = int_to_ptr.vmem [resolvable:$true] %s19_s26  ;;  %s43_s28 = int_to_ptr.vmem [resolvable:$true] %s42_s28 }
  0x10   :  { %s358_s29 = scalar_lea.vmem %s20_s26, 128  ;;  %p363_p6 = scmp.lt.s32.totalorder %s20_s26, %s20_s26 }
  0x11   :  { %p359_p5 = scmp.ne.s32.totalorder %s20_s26, %s358_s29  ;;  %p364_p7 = scmp.lt.s32.totalorder %s358_s29, %s358_s29 }
  0x13   :  { %p365_p8 = por %p364_p7, %p363_p6 }
  0x15   :  { %p366_p9 = pnand %p365_p8, %p359_p5 }
  0x17   :  { %369 = shalt.err (!%p366_p9)
}
  0x18   :  { %22 = dma.hbm_to_vmem [thread:$0]  %s472_s0, 128, %s20_s26, [#allocation3]  }
  0x19   :  { %s378_s7 = scalar_lea.vmem %s43_s28, 2048  ;;  %p383_p11 = scmp.lt.s32.totalorder %s43_s28, %s43_s28 }
  0x1a   :  { %p379_p10 = scmp.ne.s32.totalorder %s43_s28, %s378_s7  ;;  %p384_p12 = scmp.lt.s32.totalorder %s378_s7, %s378_s7 }
  0x1c   :  { %p385_p13 = por %p384_p12, %p383_p11 }
  0x1e   :  { %p386_p0 = pnand %p385_p13, %p379_p10 }
  0x20   :  { %389 = shalt.err (!%p386_p0)
}
  0x21   :  { %48 = dma.hbm_to_vmem [thread:$0]  %s475_s3, 2048, %s43_s28, [#allocation6], %s417_s21, %s417_s21, %s418_s22  }
  0x22   :  { %410 = dma.done.wait [#allocation3], 128  }
  0x23   :  { %411 = vsyncadd [#allocation3], 4294967168 }
  0x24   :  { %412 = dma.done.wait [#allocation6], 2304  }
  0x25   :  { %413 = vsyncadd [#allocation6], 4294964992  ;;  %v421_v0 = vmov 0.0   ;;  %vm422_vm0 = vmmov 0   ;;  %v62_v1 = vld [vmem:[#allocation5 + $0x8] sm:$0xff]  ;;  %v61_v2 = vld [vmem:[#allocation5] sm:$0xff] }
  0x26   :  { %278 = vmatprep.subr.mxu0 %v421_v0  ;;  %282 = vmatprep.mubr.msk.f32.mxu0 %vm422_vm0, %v421_v0  ;;  %v60_v3 = vld [vmem:[#allocation2] sm:$0xff]  ;;  %vm70_vm1 = vcmask 130048   ;;  %v160_v4 = vld [vmem:[#allocation7 + $0x78] sm:$0xff]  ;;  %v159_v5 = vld [vmem:[#allocation7 + $0x70] sm:$0xff]  ;;  %s423_s11 = smov [#allocation8]  }
  0x27   :  { %285 = vmatprep.subr.mxu1 %v421_v0  ;;  %317 = vmatprep.mubr.msk.f32.mxu1 %vm422_vm0, %v421_v0  ;;  %v158_v6 = vld [vmem:[#allocation7 + $0x68] sm:$0xff]  ;;  %v157_v7 = vld [vmem:[#allocation7 + $0x60] sm:$0xff]  ;;  %v156_v8 = vld [vmem:[#allocation7 + $0x58] sm:$0xff]  ;;  %s245_s12 = sshll.u32 %s423_s11, 4  ;;  %s246_s12 = int_to_ptr.vmem [resolvable:$true] %s245_s12 }
  0x28   :  { %279 = vmatpush3.msra.mxu0 %v62_v1  ;;  %286 = vmatpush3.msra.mxu1 %v160_v4  ;;  %v155_v9 = vld [vmem:[#allocation7 + $0x50] sm:$0xff]  ;;  %v154_v10 = vld [vmem:[#allocation7 + $0x48] sm:$0xff]  ;;  %v153_v11 = vld [vmem:[#allocation7 + $0x40] sm:$0xff]  ;;  %s390_s13 = scalar_lea.vmem %s246_s12, 128  ;;  %p395_p2 = scmp.lt.s32.totalorder %s246_s12, %s246_s12 }
  0x29   :  { %280 = vmatprep.subr.mxu0 %v421_v0  ;;  %287 = vmatprep.subr.mxu1 %v421_v0  ;;  %v152_v12 = vld [vmem:[#allocation7 + $0x38] sm:$0xff]  ;;  %v151_v13 = vld [vmem:[#allocation7 + $0x30] sm:$0xff]  ;;  %v150_v14 = vld [vmem:[#allocation7 + $0x28] sm:$0xff]  ;;  %p391_p1 = scmp.ne.s32.totalorder %s246_s12, %s390_s13  ;;  %p396_p3 = scmp.lt.s32.totalorder %s390_s13, %s390_s13 }
  0x2a   :  { %281 = vmatpush3.msra.mxu0 %v61_v2  ;;  %288 = vmatpush3.msra.mxu1 %v159_v5  ;;  %v149_v15 = vld [vmem:[#allocation7 + $0x20] sm:$0xff]  ;;  %v148_v16 = vld [vmem:[#allocation7 + $0x18] sm:$0xff]  ;;  %v147_v17 = vld [vmem:[#allocation7 + $0x10] sm:$0xff] }
  0x2b   :  { %283 = vmatmul.mubr.msk.f32.vlgmr.msra.gmra.mxu0 %vm70_vm1, %v60_v3  ;;  %289 = vmatprep.subr.mxu1 %v421_v0  ;;  %v146_v18 = vld [vmem:[#allocation7 + $0x8] sm:$0xff]  ;;  %v145_v19 = vld [vmem:[#allocation7] sm:$0xff]  ;;  %p397_p4 = por %p396_p3, %p395_p2 }
  0x2c   :  { %290 = vmatpush3.msra.mxu1 %v158_v6  ;;  %v255_v20 = vld [vmem:[%s474_s2] ss:$0 sm:$0xff] }
  0x2d   :  { %291 = vmatprep.subr.mxu1 %v421_v0  ;;  %v257_v25 = vld [vmem:[%s476_s4] ss:$0 sm:$0xff]  ;;  %p398_p5 = pnand %p397_p4, %p391_p1 }
  0x2e   :  { %292 = vmatpush3.msra.mxu1 %v157_v7 }
  0x2f   :  { %293 = vmatprep.subr.mxu1 %v421_v0 }
  0x30   :  { %294 = vmatpush3.msra.mxu1 %v156_v8 }
  0x31   :  { %295 = vmatprep.subr.mxu1 %v421_v0 }
  0x32   :  { %296 = vmatpush3.msra.mxu1 %v155_v9 }
  0x33   :  { %297 = vmatprep.subr.mxu1 %v421_v0 }
  0x34   :  { %298 = vmatpush3.msra.mxu1 %v154_v10 }
  0x35   :  { %299 = vmatprep.subr.mxu1 %v421_v0 }
  0x36   :  { %300 = vmatpush3.msra.mxu1 %v153_v11 }
  0x37   :  { %301 = vmatprep.subr.mxu1 %v421_v0 }
  0x38   :  { %302 = vmatpush3.msra.mxu1 %v152_v12 }
  0x39   :  { %303 = vmatprep.subr.mxu1 %v421_v0 }
  0x3a   :  { %304 = vmatpush3.msra.mxu1 %v151_v13 }
  0x3b   :  { %305 = vmatprep.subr.mxu1 %v421_v0 }
  0x3c   :  { %306 = vmatpush3.msra.mxu1 %v150_v14 }
  0x3d   :  { %307 = vmatprep.subr.mxu1 %v421_v0 }
  0x3e   :  { %308 = vmatpush3.msra.mxu1 %v149_v15 }
  0x3f   :  { %309 = vmatprep.subr.mxu1 %v421_v0 }
  0x40   :  { %310 = vmatpush3.msra.mxu1 %v148_v16 }
  0x41   :  { %311 = vmatprep.subr.mxu1 %v421_v0 }
  0x42   :  { %312 = vmatpush3.msra.mxu1 %v147_v17 }
  0x43   :  { %313 = vmatprep.subr.mxu1 %v421_v0 }
  0x44   :  { %314 = vmatpush3.msra.mxu1 %v146_v18 }
  0x45   :  { %315 = vmatprep.subr.mxu1 %v421_v0 }
  0x46   :  { %316 = vmatpush3.msra.mxu1 %v145_v19 }
  0xeb   :  { %v140_v21 = vpop.f32.mrf.mxu0 }
  0xec   :  { %v141_v22 = vadd.f32 %v255_v20, %v140_v21 }
  0xed   :  { %v284_v23 = vpop.f32.mrf.mxu0 }
  0xee   :  { %328 = vtanh.f32 %v141_v22 }
  0xfb   :  { %v329_v24 = vpop.eup %328 }
  0xfc   :  { %318 = vmatmul.mubr.f32.vlgmr.msra.gmra.mxu1 %v329_v24 }
 0x1bc   :  { %v234_v26 = vpop.f32.mrf.mxu1 }
 0x1bd   :  { %v235_v27 = vadd.f32 %v257_v25, %v234_v26 }
 0x1be   :  { %v319_v28 = vpop.f32.mrf.mxu1 }
 0x1bf   :  { %238 = vst [vmem:[#allocation8] sm:$0xff] %v235_v27 }
 0x1c0   :  { %401 = shalt.err (!%p398_p5)
}
 0x1c1   :  { %248 = dma.vmem_to_hbm [thread:$0]  %s246_s12, 128, %s477_s5, [#allocation4]  }
 0x1c2   :  { %414 = dma.done.wait [#allocation4], 128  }
 0x1c3   :  { %415 = vsyncadd [#allocation4], 4294967168 }
 0x1c4   :  { %252 = vsyncpa [#allocation3], 1 }
 0x1c5   :  { %253 = vsyncpa [#allocation6], 1 }
 0x1c6   :  { %254 = vsyncpa [#allocation4], 1 }

</bundles_post_ra>
